<compile_context>
chip_gen: v5e
topology: v5e:2x2
jax: 0.10.0
libtpu: 0.0.40
codegen_flags: <defaults>
</compile_context>

<pallas_src>
import functools

import jax
import jax.numpy as jnp
from jax.experimental import pallas as pl
from jax.experimental.pallas import tpu as pltpu

LN_EPS = 1e-5  # torch.nn.LayerNorm default eps


def _round_up(x, m):
    return (x + m - 1) // m * m


def mlp_kernel(x_ref, w_ref, p_ref, o_ref, *scratch, tn, n_j, o_true, masked):
    # x_ref:   (TM, TK)   token tile
    # w_ref:   (TK, TN)   K-major weight tile (pre-transposed in the wrapper)
    # p_ref:   (3, Op)    stacked [bias, gamma, beta] (f32), resident
    # o_ref:   (TM, Op)   output tile, resident across (k, j)
    # scratch: optional (TM, Op) f32 accumulator (omitted when output dtype is f32)
    k = pl.program_id(1)
    j = pl.program_id(2)
    nk = pl.num_programs(1)
    nj = pl.num_programs(2)

    acc_ref = scratch[0] if scratch else o_ref  # f32 either way

    @pl.when((k == 0) & (j == 0))
    def _init():
        acc_ref[...] = jnp.zeros_like(acc_ref)

    partial_sum = jax.lax.dot_general(
        x_ref[...],
        w_ref[...],
        dimension_numbers=(((1,), (0,)), ((), ())),  # (TM,TK) @ (TK,TN)
        preferred_element_type=jnp.float32,
    )
    if n_j == 1:
        acc_ref[...] += partial_sum
    else:
        off = pl.multiple_of(j * tn, tn)
        acc_ref[:, pl.ds(off, tn)] += partial_sum

    @pl.when((k == nk - 1) & (j == nj - 1))
    def _epilogue():
        bias = p_ref[0:1, :]
        gamma = p_ref[1:2, :]
        beta = p_ref[2:3, :]

        y = acc_ref[...] + bias  # padded O columns: acc=0, bias=0 -> y=0
        inv_o = 1.0 / float(o_true)
        if masked:
            lane = jax.lax.broadcasted_iota(jnp.int32, y.shape, 1)
            valid = lane < o_true
            y = jnp.where(valid, y, 0.0)
            mean = jnp.sum(y, axis=-1, keepdims=True) * inv_o
            centered = jnp.where(valid, y - mean, 0.0)
        else:
            mean = jnp.sum(y, axis=-1, keepdims=True) * inv_o
            centered = y - mean
        var = jnp.sum(centered * centered, axis=-1, keepdims=True) * inv_o
        inv_std = jax.lax.rsqrt(var + LN_EPS)
        # Padded gamma/beta are zero -> padded output columns become 0 (sliced off).
        normed = centered * inv_std * gamma + beta
        o_ref[...] = jnp.maximum(normed, 0.0).astype(o_ref.dtype)


def mlp_forward(
    x,
    weight,
    bias,
    gamma,
    beta,
    *,
    tm_max=512,
    tk_max=1024,
    tn_max=2048,
    vmem_budget=40 * 1024 * 1024,
):
    """x: (..., H). weight: (O, H) torch layout. Returns relu(LN(x @ W^T + b))."""
    *lead, H = x.shape
    O, Hw = weight.shape
    assert Hw == H, "weight must be (out_features, hidden_size)"

    out_dtype = x.dtype
    x2d = x.reshape(-1, H)
    N = x2d.shape[0]

    in_item = jnp.dtype(x.dtype).itemsize
    out_item = jnp.dtype(out_dtype).itemsize
    use_scratch = jnp.dtype(out_dtype) != jnp.dtype(jnp.float32)

    # ---- K (contraction) tiling: full H when small, else 128-aligned chunks ----
    if H <= tk_max:
        TK, Hp = H, H
    else:
        if H % 1024 == 0:
            TK = 1024
        elif H % 512 == 0:
            TK = 512
        else:
            TK = 512
        Hp = _round_up(H, TK)

    # ---- O: pad to a lane-dense multiple of 128; tile when large ----
    Op = _round_up(O, 128)
    if Op <= tn_max:
        TN = Op
    else:
        TN = 512
        Op = _round_up(Op, TN)
    masked = Op != O
    n_j = Op // TN

    # ---- token tile: minimize padding, keep >=2 "parallel" steps when possible ----
    candidates = [c for c in (512, 256, 128, 64, 32, 16, 8) if c <= max(tm_max, 8)]
    TM = min(candidates, key=lambda c: (_round_up(N, c) - N, -c))
    if _round_up(N, TM) // TM < 2:
        half = max(8, _round_up((_round_up(N, 8) + 1) // 2, 8))
        if half < TM and _round_up(N, half) // half >= 2:
            TM = half  # give the 2nd TensorCore something to do (v7x / megacore)

    def footprint(tm_):
        f = 2 * tm_ * TK * in_item           # x tile (double buffered)
        f += 2 * TK * TN * in_item           # weight tile (double buffered)
        f += 2 * tm_ * Op * out_item         # output tile (double buffered)
        if use_scratch:
            f += tm_ * Op * 4                # f32 accumulator scratch
        f += 2 * 3 * Op * 4                  # stacked params
        return f

    while TM > 8 and footprint(TM) > vmem_budget:
        TM = max(8, TM // 2)

    Np = _round_up(N, TM)

    # ---- zero-pad operands (neutral for matmul; padded rows/cols sliced off) ----
    if Np != N or Hp != H:
        x2d = jnp.pad(x2d, ((0, Np - N), (0, Hp - H)))
    wT = weight.T  # one-time transpose to K-major (H, O); amortized over all tiles
    if Hp != H or Op != O:
        wT = jnp.pad(wT, ((0, Hp - H), (0, Op - O)))
    pad_o = Op - O
    params = jnp.stack(
        [
            jnp.pad(bias.astype(jnp.float32), (0, pad_o)),
            jnp.pad(gamma.astype(jnp.float32), (0, pad_o)),
            jnp.pad(beta.astype(jnp.float32), (0, pad_o)),
        ]
    )

    n_i = Np // TM
    grid = (n_i, Hp // TK, n_j)  # (token tiles, K reduction, O tiles); O innermost

    cost = pl.CostEstimate(
        flops=2 * Np * Hp * Op,
        transcendentals=0,
        # weight is re-streamed once per token tile; x streamed once; out written once
        bytes_accessed=(n_i * Hp * Op + Np * Hp) * in_item + Np * Op * out_item,
    )

    scratch_shapes = [pltpu.VMEM((TM, Op), jnp.float32)] if use_scratch else []
    vmem_limit = int(min(max(2 * footprint(TM), 32 * 1024 * 1024), 60 * 1024 * 1024))
    # TODO(synk): make tm_max / vmem_budget generation-aware via pltpu.get_tpu_info
    # (v5e can stay at TM~256; v5e/v6e could raise the limit toward 96 MiB).

    kernel = functools.partial(mlp_kernel, tn=TN, n_j=n_j, o_true=O, masked=masked)

    out = pl.pallas_call(
        kernel,
        out_shape=jax.ShapeDtypeStruct((Np, Op), out_dtype),
        grid_spec=pltpu.PrefetchScalarGridSpec(
            num_scalar_prefetch=0,
            grid=grid,
            in_specs=[
                pl.BlockSpec((TM, TK), lambda i, k, j: (i, k)),  # x tile
                pl.BlockSpec((TK, TN), lambda i, k, j: (k, j)),  # K-major weight tile
                pl.BlockSpec((3, Op), lambda i, k, j: (0, 0)),   # stacked bias/gamma/beta
            ],
            out_specs=pl.BlockSpec((TM, Op), lambda i, k, j: (i, 0)),
            scratch_shapes=scratch_shapes,
        ),
        compiler_params=pltpu.CompilerParams(
            dimension_semantics=("parallel", "arbitrary", "arbitrary"),
            vmem_limit_bytes=vmem_limit,
        ),
        cost_estimate=cost,
    )(x2d, wT, params)

    return out[:N, :O].reshape(*lead, O)


if __name__ == "__main__":
    key = jax.random.PRNGKey(0)
    B, S, H = 2, 8, 32
    O = H  # out_features defaults to hidden_size

    k_x, k_w, k_b = jax.random.split(key, 3)
    x = jax.random.normal(k_x, (B, S, H), dtype=jnp.float32)
    weight = jax.random.normal(k_w, (O, H), dtype=jnp.float32) * (1.0 / jnp.sqrt(H))
    bias = jax.random.normal(k_b, (O,), dtype=jnp.float32) * 0.01
    gamma = jnp.ones((O,), dtype=jnp.float32)
    beta = jnp.zeros((O,), dtype=jnp.float32)

    out = mlp_forward(x, weight, bias, gamma, beta)
    jax.block_until_ready(out)

    # Plain-JAX reference.
    y_ref = x @ weight.T + bias
    mu = y_ref.mean(-1, keepdims=True)
    var = ((y_ref - mu) ** 2).mean(-1, keepdims=True)
    ref = jnp.maximum((y_ref - mu) / jnp.sqrt(var + LN_EPS) * gamma + beta, 0.0)

    assert out.shape == (B, S, O)
    assert jnp.allclose(out, ref, atol=1e-4, rtol=1e-4)

    print("KERNEL_OK")
</pallas_src>

<mosaic_0001>
module attributes {stable_mosaic.version = 11 : i64} {
  func.func @mlp_kernel(%arg0: i32, %arg1: i32, %arg2: i32, %arg3: memref<8x32xf32, #tpu.memory_space<vmem>>, %arg4: memref<32x128xf32, #tpu.memory_space<vmem>>, %arg5: memref<3x128xf32, #tpu.memory_space<vmem>>, %arg6: memref<8x128xf32, #tpu.memory_space<vmem>>) attributes {dimension_semantics = [#tpu.dimension_semantics<parallel>, #tpu.dimension_semantics<arbitrary>, #tpu.dimension_semantics<arbitrary>], iteration_bounds = array<i64: 2, 1, 1>, scalar_prefetch = 0 : i64, scratch_operands = 0 : i64, tpu.core_type = #tpu.core_type<tc>, window_params = [{transform_indices = @transform_0, window_bounds = array<i64: 8, 32>}, {transform_indices = @transform_1, window_bounds = array<i64: 32, 128>}, {pipeline_mode = #tpu.pipeline_mode<synchronous>, transform_indices = @transform_2, window_bounds = array<i64: 3, 128>}, {transform_indices = @transform_3, window_bounds = array<i64: 8, 128>}]} {
    %c0_i32 = arith.constant 0 : i32
    %0 = arith.cmpi eq, %arg1, %c0_i32 : i32
    %c0_i32_0 = arith.constant 0 : i32
    %1 = arith.cmpi eq, %arg2, %c0_i32_0 : i32
    %2 = arith.andi %0, %1 : i1
    %3 = arith.extui %2 : i1 to i32
    %c0_i32_1 = arith.constant 0 : i32
    %4 = arith.cmpi ne, %3, %c0_i32_1 : i32
    scf.if %4 {
      %cst_12 = arith.constant 0.000000e+00 : f32
      %16 = vector.broadcast %cst_12 : f32 to vector<8x128xf32>
      %c0_13 = arith.constant 0 : index
      %c0_14 = arith.constant 0 : index
      %17 = vector.load %arg6[%c0_13, %c0_14] : memref<8x128xf32, #tpu.memory_space<vmem>>, vector<8x128xf32>
      tpu.vector_store %arg6[%c0_13, %c0_14], %16 {strides = array<i32>} : memref<8x128xf32, #tpu.memory_space<vmem>>, vector<8x128xf32>,
    } else {
    }
    %c0 = arith.constant 0 : index
    %c0_2 = arith.constant 0 : index
    %5 = vector.load %arg3[%c0, %c0_2] : memref<8x32xf32, #tpu.memory_space<vmem>>, vector<8x32xf32>
    %c0_3 = arith.constant 0 : index
    %c0_4 = arith.constant 0 : index
    %6 = vector.load %arg4[%c0_3, %c0_4] : memref<32x128xf32, #tpu.memory_space<vmem>>, vector<32x128xf32>
    %cst = arith.constant dense<0.000000e+00> : vector<8x128xf32>
    %7 = tpu.matmul %5, %6, %cst {dimension_numbers = #tpu.dot_dimension_numbers<[1], [0], [0], [1], [0, 0, 1, 1], [], []>} : vector<8x32xf32>, vector<32x128xf32>, vector<8x128xf32> -> vector<8x128xf32>
    %c0_5 = arith.constant 0 : index
    %c0_6 = arith.constant 0 : index
    %8 = vector.load %arg6[%c0_5, %c0_6] : memref<8x128xf32, #tpu.memory_space<vmem>>, vector<8x128xf32>
    %9 = arith.addf %8, %7 : vector<8x128xf32>
    %c0_7 = arith.constant 0 : index
    %c0_8 = arith.constant 0 : index
    %10 = vector.load %arg6[%c0_7, %c0_8] : memref<8x128xf32, #tpu.memory_space<vmem>>, vector<8x128xf32>
    tpu.vector_store %arg6[%c0_7, %c0_8], %9 {strides = array<i32>} : memref<8x128xf32, #tpu.memory_space<vmem>>, vector<8x128xf32>,
    %c0_i32_9 = arith.constant 0 : i32
    %11 = arith.cmpi eq, %arg1, %c0_i32_9 : i32
    %c0_i32_10 = arith.constant 0 : i32
    %12 = arith.cmpi eq, %arg2, %c0_i32_10 : i32
    %13 = arith.andi %11, %12 : i1
    %14 = arith.extui %13 : i1 to i32
    %c0_i32_11 = arith.constant 0 : i32
    %15 = arith.cmpi ne, %14, %c0_i32_11 : i32
    scf.if %15 {
      %c0_12 = arith.constant 0 : index
      %c0_13 = arith.constant 0 : index
      %16 = vector.load %arg5[%c0_12, %c0_13] : memref<3x128xf32, #tpu.memory_space<vmem>>, vector<1x128xf32>
      %c1 = arith.constant 1 : index
      %c0_14 = arith.constant 0 : index
      %17 = vector.load %arg5[%c1, %c0_14] : memref<3x128xf32, #tpu.memory_space<vmem>>, vector<1x128xf32>
      %c2 = arith.constant 2 : index
      %c0_15 = arith.constant 0 : index
      %18 = vector.load %arg5[%c2, %c0_15] : memref<3x128xf32, #tpu.memory_space<vmem>>, vector<1x128xf32>
      %c0_16 = arith.constant 0 : index
      %c0_17 = arith.constant 0 : index
      %19 = vector.load %arg6[%c0_16, %c0_17] : memref<8x128xf32, #tpu.memory_space<vmem>>, vector<8x128xf32>
      %20 = vector.broadcast %16 : vector<1x128xf32> to vector<8x128xf32>
      %21 = arith.addf %19, %20 : vector<8x128xf32>
      %22 = tpu.iota {dimensions = array<i32: 1>} : vector<8x128xi32>
      %c32_i32 = arith.constant 32 : i32
      %23 = vector.broadcast %c32_i32 : i32 to vector<8x128xi32>
      %24 = arith.cmpi slt, %22, %23 : vector<8x128xi32>
      %cst_18 = arith.constant 0.000000e+00 : f32
      %25 = vector.broadcast %cst_18 : f32 to vector<8x128xf32>
      %26 = arith.select %24, %21, %25 : vector<8x128xi1>, vector<8x128xf32>
      %cst_19 = arith.constant dense<0.000000e+00> : vector<8xf32>
      %27 = vector.multi_reduction <add>, %26, %cst_19 [1] : vector<8x128xf32> to vector<8xf32>
      %28 = vector.shape_cast %27 : vector<8xf32> to vector<8x1xf32>
      %cst_20 = arith.constant 3.125000e-02 : f32
      %29 = vector.broadcast %cst_20 : f32 to vector<8x1xf32>
      %30 = arith.mulf %28, %29 : vector<8x1xf32>
      %31 = vector.broadcast %30 : vector<8x1xf32> to vector<8x128xf32>
      %32 = arith.subf %26, %31 : vector<8x128xf32>
      %cst_21 = arith.constant 0.000000e+00 : f32
      %33 = vector.broadcast %cst_21 : f32 to vector<8x128xf32>
      %34 = arith.select %24, %32, %33 : vector<8x128xi1>, vector<8x128xf32>
      %35 = arith.mulf %34, %34 : vector<8x128xf32>
      %cst_22 = arith.constant dense<0.000000e+00> : vector<8xf32>
      %36 = vector.multi_reduction <add>, %35, %cst_22 [1] : vector<8x128xf32> to vector<8xf32>
      %37 = vector.shape_cast %36 : vector<8xf32> to vector<8x1xf32>
      %cst_23 = arith.constant 3.125000e-02 : f32
      %38 = vector.broadcast %cst_23 : f32 to vector<8x1xf32>
      %39 = arith.mulf %37, %38 : vector<8x1xf32>
      %cst_24 = arith.constant 9.99999974E-6 : f32
      %40 = vector.broadcast %cst_24 : f32 to vector<8x1xf32>
      %41 = arith.addf %39, %40 : vector<8x1xf32>
      %42 = math.rsqrt %41 : vector<8x1xf32>
      %43 = vector.broadcast %42 : vector<8x1xf32> to vector<8x128xf32>
      %44 = arith.mulf %34, %43 : vector<8x128xf32>
      %45 = vector.broadcast %17 : vector<1x128xf32> to vector<8x128xf32>
      %46 = arith.mulf %44, %45 : vector<8x128xf32>
      %47 = vector.broadcast %18 : vector<1x128xf32> to vector<8x128xf32>
      %48 = arith.addf %46, %47 : vector<8x128xf32>
      %cst_25 = arith.constant 0.000000e+00 : f32
      %49 = vector.broadcast %cst_25 : f32 to vector<8x128xf32>
      %50 = arith.maximumf %48, %49 : vector<8x128xf32>
      %c0_26 = arith.constant 0 : index
      %c0_27 = arith.constant 0 : index
      %51 = vector.load %arg6[%c0_26, %c0_27] : memref<8x128xf32, #tpu.memory_space<vmem>>, vector<8x128xf32>
      tpu.vector_store %arg6[%c0_26, %c0_27], %50 {strides = array<i32>} : memref<8x128xf32, #tpu.memory_space<vmem>>, vector<8x128xf32>,
    } else {
    }
    return
  }
  func.func @transform_0(%arg0: i32, %arg1: i32, %arg2: i32) -> (i32, i32) {
    %c0_i32 = arith.constant 0 : i32
    return %arg0, %arg1 : i32, i32
  }
  func.func @transform_1(%arg0: i32, %arg1: i32, %arg2: i32) -> (i32, i32) {
    %c0_i32 = arith.constant 0 : i32
    return %arg1, %arg2 : i32, i32
  }
  func.func @transform_2(%arg0: i32, %arg1: i32, %arg2: i32) -> (i32, i32) {
    %c0_i32 = arith.constant 0 : i32
    %c0_i32_0 = arith.constant 0 : i32
    %c0_i32_1 = arith.constant 0 : i32
    return %c0_i32, %c0_i32_0 : i32, i32
  }
  func.func @transform_3(%arg0: i32, %arg1: i32, %arg2: i32) -> (i32, i32) {
    %c0_i32 = arith.constant 0 : i32
    %c0_i32_0 = arith.constant 0 : i32
    return %arg0, %c0_i32 : i32, i32
  }
}

</mosaic_0001>

<bundles_post_ra>
// kernel: tpu_custom_call.1
= control target key start
LH: loop header
LB: loop body
LE: loop exit
PB: predicated region body
PF: predicated region fallthrough
CT: control target
= control target key end

     0   :  { %8 = vsyncpa [#allocation3], 0  ;;  %s911_s0 = inlined_call_operand.hbm [shape: f32[16,32], index: 0, kind: input, shape index: {}]   ;;  %s912_s1 = inlined_call_operand.hbm [shape: f32[32,128], index: 1, kind: input, shape index: {}]   ;;  %s913_s2 = inlined_call_operand.hbm [shape: f32[3,128], index: 2, kind: input, shape index: {}]   ;;  %s914_s3 = inlined_call_operand.hbm [shape: f32[16,128], index: 3, kind: output, shape index: {}]  }
   0x1   :  { %10 = vsyncpa [#allocation3 + $0x1], 0 }
   0x2   :  { %11 = vsyncpa [#allocation6], 0 }
   0x3   :  { %12 = vsyncpa [#allocation4], 0 }
   0x4   :  { %14 = vsyncpa [#allocation4 + $0x1], 0  ;;  %s763_s12 = smov 0   ;;  %s765_s13 = smov 0  }
   0x5   :  { %s767_s14 = smov 0   ;;  %s769_s15 = smov 0  }
   0x6   :  { %s771_s16 = smov 0   ;;  %s773_s17 = smov 0  }
   0x7 LB: > { %s452_s18 = sadd.s32 4294967295, %s737_s17   ;;  %p454_p0 = scmp.ge.s32.totalorder %s737_s17, 1  ;;  %s737_s17 = sphi %s773_s17, %s20_s17   ;;  %s733_s16 = sphi %s771_s16, %s924_s16   ;;  %s729_s15 = sphi %s769_s15, %s923_s15   ;;  %s725_s14 = sphi %s767_s14, %s922_s14   ;;  %s721_s13 = sphi %s765_s13, %s921_s13   ;;  %s717_s12 = sphi %s763_s12, %s920_s12  }
   0x8   : > { %p797_p1 = scmp.eq.s32.totalorder %s452_s18, 0  ;;  %p147_p2 = scmp.lt.s32.totalorder %s737_s17, 3 }
   0x9   : > { %s162_s22 = sshll.u32 %s912_s1, 4  ;;  %s739_s24 = smov [#allocation5]   ;;  %s163_s22 = int_to_ptr.hbm [resolvable:$true] %s162_s22 }
   0xa   : > { %p805_p3 = pnand %p454_p0, %p147_p2  ;;  %s164_s25 = sshll.u32 %s739_s24, 4  ;;  %s165_s25 = int_to_ptr.vmem [resolvable:$true] %s164_s25 }
   0xb   : > { %p457_p6 = scmp.ge.s32.totalorder %s737_s17, 2  ;;  %s177_s28 = sshll.u32 %s913_s2, 4  ;;  %s178_s28 = int_to_ptr.hbm [resolvable:$true] %s177_s28 }
   0xc   : > { %p482_p4 = pneg %p805_p3  ;;  %s740_s29 = smov 128  }
   0xd   : > { %s741_s30 = smov 8   ;;  %s742_s4 = smov [#allocation7]  }
   0xe   : > { %p483_p5 = pnand %p482_p4, %p797_p1  ;;  %s179_s5 = sshll.u32 %s742_s4, 4  ;;  %s180_s5 = int_to_ptr.vmem [resolvable:$true] %s179_s5 }
   0xf   : > { %s39_s6 = sadd.s32 1, %s733_s16  ;;  %s453_s7 = sadd.s32 4294967294, %s737_s17  }
  0x10   : > { %485 = dma.hbm_to_vmem [thread:$0]  (!%p483_p5), %s163_s22, 512, %s165_s25, [#allocation6], %s740_s29, %s740_s29, %s741_s30  }
  0x11   : > { %488 = dma.hbm_to_vmem [thread:$0]  (!%p483_p5), %s178_s28, 64, %s180_s5, [#allocation6]  }
  0x12   : > { %p41_p7 = scmp.ge.s32.totalorder %s39_s6, 2  ;;  %s48_s8 = sadd.s32 1, %s725_s14 }
  0x13   : > { %p55_p8 = scmp.ne.s32.totalorder %s725_s14, %s721_s13  ;;  %p56_p9 = scmp.eq.s32.totalorder %s737_s17, 0 }
  0x14   : > { %s926_s6 = smov (%p41_p7, %s39_s6), 0  ;;  %p61_p10 = scmp.ne.s32.totalorder %s721_s13, %s717_s12 }
  0x15   : > { %s43_s9 = ssub.s32 %s733_s16, %s926_s6  ;;  %p134_p11 = scmp.eq.s32.totalorder %s452_s18, 1 }
  0x16   : > { %p46_p12 = scmp.eq.s32.totalorder %s43_s9, 0  ;;  %p833_p13 = por %p797_p1, %p61_p10 }
  0x17   : > { %p837_p0 = por %p134_p11, %p55_p8  ;;  %p140_p2 = scmp.eq.s32.totalorder %s453_s7, 1 }
  0x18   : > { %s842_s20 = scalar_select %p46_p12, %s725_s14, %s48_s8  }
  0x19   : > { %p57_p4 = por %p56_p9, %p55_p8  ;;  %p844_p5 = por %p140_p2, %p61_p10 }
  0x1a   : > { %s190_s22 = sand.u32 1, %s725_s14   ;;  %s459_s18 = sshll.u32 %s733_s16, 3 }
  0x1b   : > { %p499_p7 = scmp.lt.s32.totalorder %s737_s17, 2  ;;  %s458_s24 = sshll.u32 %s190_s22, 3 }
  0x1c   : > { %s199_s27 = scalar_lea.hbm %s911_s0, %s459_s18  ;;  %s194_s29 = scalar_lea.vmem [#allocation2], %s458_s24 }
  0x1d   : > { %s201_s28 = sshll.u32 %s199_s27, 4  ;;  %s203_s30 = sshll.u32 %s194_s29, 4  ;;  %s202_s28 = int_to_ptr.hbm [resolvable:$true] %s201_s28  ;;  %s204_s30 = int_to_ptr.vmem [resolvable:$true] %s203_s30 }
  0x1e   : > { %p490_p11 = pnand %p499_p7, %p57_p4  ;;  %s191_s4 = scalar_lea.sflag [#allocation3], %s190_s22 }
  0x1f   : > { %212 = sbr.rel (%p805_p3) target bundleno = 448 (0x1c0), region = 32  ;;  %s857_s5 = sand.u32 (!%p805_p3), 1, %s721_s13  }
  0x20   : > { %492 = dma.hbm_to_vmem [thread:$0]  (!%p490_p11), %s202_s28, 128, %s204_s30, %s191_s4  }
  0x21   : > { %s461_s7 = sshll.u32 (!%p805_p3), %s857_s5, 3  ;;  %s215_s8 = scalar_lea.sflag (!%p805_p3), [#allocation3], %s857_s5 }
  0x22   : > { %s218_s9 = scalar_lea.vmem (!%p805_p3), [#allocation2], %s461_s7 }
  0x24   : > { %704 = dma.done.wait (%p833_p13), %s215_s8, 128  }
  0x25   : > { %706 = vsyncadd (%p833_p13), %s215_s8, 4294967168 }
  0x26   : > { %708 = dma.done.wait (%p797_p1), [#allocation6], 576  }
  0x27   : > { %710 = vsyncadd (%p797_p1), [#allocation6], 4294966720  ;;  %v264_v0 = vld [vmem:[#allocation5 + $0x18] sm:$0xff]  ;;  %v263_v1 = vld [vmem:[#allocation5 + $0x10] sm:$0xff]  ;;  %vm265_vm0 = vcmask 261120   ;;  %v300_v5 = vlaneseq  ;;  %s467_s19 = sshll.u32 %s729_s15, 3 }
  0x28   : > { %281 = vmatpush.msra.mxu0 %v264_v0  ;;  %v262_v2 = vld [vmem:[#allocation5 + $0x8] sm:$0xff]  ;;  %v261_v3 = vld [vmem:[#allocation5] sm:$0xff]  ;;  %v260_v4 = vld [vmem:[%s218_s9] sm:$0xff]  ;;  %s342_s22 = scalar_lea.hbm %s914_s3, %s467_s19  ;;  %s251_s18 = scalar_lea.vmem [#allocation8], %s461_s7 }
  0x29   : > { %v301_v6 = vand.u32 127, %v300_v5  ;;  %v556_v7 = vld [vmem:[#allocation7] ss:$0 sm:$0xff]  ;;  %v557_v25 = vld [vmem:[#allocation7 + $0x1] ss:$0 sm:$0xff]  ;;  %s344_s24 = sshll.u32 %s251_s18, 4  ;;  %s345_s24 = int_to_ptr.vmem [resolvable:$true] %s344_s24 }
  0x2a   : > { %282 = vmatpush.msra.mxu0 %v263_v1  ;;  %v558_v27 = vld [vmem:[#allocation7 + $0x2] ss:$0 sm:$0xff]  ;;  %s346_s25 = sshll.u32 %s342_s22, 4  ;;  %s332_s15 = scalar_lea.sflag [#allocation4], %s857_s5  ;;  %s347_s25 = int_to_ptr.hbm [resolvable:$true] %s346_s25 }
  0x2b   : > { %vm302_vm1 = vcmp.lt.s32.totalorder %v301_v6, 32  ;;  %s665_s26 = sshra.s32 %s347_s25, 4  ;;  %s671_s30 = scalar_lea.hbm %s914_s3, 16  ;;  %s666_s26 = int_to_ptr.hbm [resolvable:$true] %s665_s26 }
  0x2c   : > { %283 = vmatpush.msra.mxu0 %v262_v2  ;;  %s667_s27 = scalar_lea.hbm %s666_s26, 8  ;;  %p672_p9 = scmp.lt.s32.totalorder %s666_s26, %s914_s3 }
  0x2d   : > { %p668_p1 = scmp.ne.s32.totalorder %s666_s26, %s667_s27  ;;  %p673_p10 = scmp.lt.s32.totalorder %s671_s30, %s667_s27 }
  0x2e   : > { %284 = vmatpush.msra.mxu0 %v261_v3 }
  0x2f   : > { %465 = vmatmul.msk.f32.vlgmr.msra.gmra.mxu0 %vm265_vm0, %v260_v4  ;;  %p669_p3 = pnand %p668_p1, %p837_p0  ;;  %p674_p12 = por %p673_p10, %p672_p9 }
  0x31   : > { %p670_p8 = pneg %p669_p3 }
  0x33   : > { %p675_p13 = pnand %p674_p12, %p670_p8 }
  0xac   : > { %v286_v8 = vpop.f32.mrf.mxu0 }
  0xad   : > { %v299_v9 = vadd.f32 %v556_v7, %v286_v8 }
  0xaf   : > { %v303_v10 = vsel %vm302_vm1, %v299_v9, 0.0 }
  0xb0   : > { %304 = vadd.xlane.f32.xlu0 %v303_v10 }
 0x123   : > { %v305_v11 = vpop.xlane.xlu0 %304 }
 0x124   : > { %v306_v12 = vmul.f32 0.03125, %v305_v11 }
 0x126   : > { %v307_v13 = vsub.f32 %v303_v10, %v306_v12 }
 0x128   : > { %v308_v14 = vsel %vm302_vm1, %v307_v13, 0.0 }
 0x129   : > { %v309_v15 = vmul.f32 %v308_v14, %v308_v14 }
 0x12b   : > { %310 = vadd.xlane.f32.xlu0 %v309_v15 }
 0x19e   : > { %v311_v16 = vpop.xlane.xlu0 %310 }
 0x19f   : > { %v312_v17 = vmul.f32 0.03125, %v311_v16 }
 0x1a1   : > { %v313_v18 = vadd.f32 1e-05, %v312_v17 }
 0x1a3   : > { %559 = vrsqrt.f32 %v313_v18  ;;  %vm320_vm3 = vweird.f32 %v313_v18 }
 0x1a9   : > { %v560_v19 = vpop.eup %559 }
 0x1aa   : > { %v315_v20 = vmul.f32 %v560_v19, %v313_v18  ;;  %vm321_vm2 = vweird.f32 %v560_v19 }
 0x1ab   : > { %vm322_vm4 = vmor %vm320_vm3, %vm321_vm2 }
 0x1ac   : > { %v316_v21 = vmul.f32 %v560_v19, %v315_v20 }
 0x1ae   : > { %v317_v22 = vmul.f32 0.5, %v316_v21 }
 0x1b0   : > { %v318_v23 = vsub.f32 1.5, %v317_v22 }
 0x1b2   : > { %v319_v24 = vmul.f32 %v560_v19, %v318_v23 }
 0x1b4   : > { %v323_v26 = vsel %vm322_vm4, %v560_v19, %v319_v24 }
 0x1b5   : > { %v324_v28 = vmul.f32 %v323_v26, %v308_v14 }
 0x1b7   : > { %v326_v29 = vmul.f32 %v557_v25, %v324_v28 }
 0x1b9   : > { %v328_v30 = vadd.f32 %v558_v27, %v326_v29 }
 0x1bb   : > { %v329_v31 = vmax.f32 %v328_v30, 0.0 }
 0x1bd   : > { %330 = vst [vmem:[%s251_s18] sm:$0xff] %v329_v31 }
 0x1be   : > { %678 = shalt.err (!%p675_p13)
}
 0x1bf   : > { %480 = dma.vmem_to_hbm [thread:$0]  (%p837_p0), %s345_s24, 128, %s347_s25, %s332_s15  }
 0x1c0 PF: > { %s358_s5 = sand.u32 1, %s717_s12   ;;  %p494_p2 = pnand %p457_p6, %p844_p5 }
 0x1c1   : > { %s359_s8 = scalar_lea.sflag [#allocation4], %s358_s5 }
 0x1c2   : > { %p495_p4 = pneg %p494_p2 }
 0x1c4   : > { %712 = dma.done.wait (%p495_p4), %s359_s8, 128  }
 0x1c5   : > { %714 = vsyncadd (%p495_p4), %s359_s8, 4294967168  ;;  %s20_s17 = sadd.s32 1, %s737_s17   ;;  %s920_s12 = smov %s721_s13 }
 0x1c6   : > { %p17_p7 = scmp.ge.s32.totalorder %s20_s17, 4   ;;  %s921_s13 = smov %s725_s14 }
 0x1c7   : > { %s922_s14 = smov %s842_s20  ;;  %s923_s15 = smov %s733_s16 }
 0x1c8   : > { %s924_s16 = smov %s926_s6  ;;  %19 = sbr.rel (!%p17_p7) target bundleno = 7 (0x7), region = 94 }
 0x1cd   :  { %365 = vsyncpa [#allocation3], 1 }
 0x1ce   :  { %367 = vsyncpa [#allocation3 + $0x1], 1 }
 0x1cf   :  { %368 = vsyncpa [#allocation6], 1 }
 0x1d0   :  { %369 = vsyncpa [#allocation4], 1 }
 0x1d1   :  { %371 = vsyncpa [#allocation4 + $0x1], 1 }

</bundles_post_ra>
